<compile_context>
chip_gen: v5e
topology: v5e:2x2
jax: 0.10.0
libtpu: 0.0.40
codegen_flags: <defaults>
</compile_context>

<pallas_src>
import jax
import jax.numpy as jnp
from jax import lax
from jax.experimental import pallas as pl
from jax.experimental.pallas import tpu as pltpu


def _round_up(v, m):
    return -(-v // m) * m


def vectorizer_forward(x, X, *, block_budget_bytes=24 << 20):
    """x: [B, C_in, M, N], X: [C_out, C_in, N] -> [B, C_out, M] float32."""
    B, C_in, M, N = x.shape
    C_out = X.shape[0]

    # Tiny weight relayout only; the big activation stays in native layout+dtype.
    w = jnp.transpose(X, (1, 0, 2))            # [C_in, C_out, N]

    # MXU-native bf16 path when both operands are bf16; otherwise cast tiles
    # to f32 inside the kernel (accumulation is always f32 either way).
    if x.dtype == jnp.bfloat16 and w.dtype == jnp.bfloat16:
        compute_dtype = jnp.bfloat16
    else:
        compute_dtype = jnp.float32

    x_item = x.dtype.itemsize
    w_item = w.dtype.itemsize
    lane_n = _round_up(N, 128)                 # N pads to 128 lanes in VMEM
    co_pad = _round_up(C_out, 8)
    DB = 2                                     # pipeline double buffering

    # Weight block is VMEM-resident (constant index_map) but still double
    # buffered by the pipeline; count both copies in the budget.
    # (pl.Buffered(1) could reclaim one copy, but the weight is tiny here.)
    w_bytes = DB * C_in * co_pad * lane_n * w_item

    # ---- choose the M tile (tm) from the explicit VMEM budget ------------
    if M <= 256:
        tm = M                                 # full-dim blocks are always legal
    else:
        per_tm = DB * (C_in * lane_n * x_item + co_pad * 4)  # x block + f32 out block
        avail = max(block_budget_bytes - w_bytes, 2 << 20)
        tm = (avail // per_tm) // 128 * 128
        # Keep the register-resident [C_out, tm] f32 accumulator under ~half
        # of the 256 KiB vreg file.
        acc_cap = max(128, ((128 << 10) // (co_pad * 4)) // 128 * 128)
        tm = max(128, min(tm, 2048, acc_cap))
        if tm >= M:
            tm = M
        elif B * pl.cdiv(M, tm) < 2:
            # v7x megacore: make sure the parallel grid has >= 2 steps.
            tm = max(128, _round_up(pl.cdiv(M, 2), 128))
    # TODO(synk): for very large C_out add a C_out grid axis or a VMEM-scratch
    # accumulator instead of shrinking tm.

    # ---- choose the batch block (bb) to amortize per-step overhead -------
    bb = 1
    x_blk_bytes = C_in * _round_up(tm, 8) * lane_n * x_item
    if B > 1 and tm == M and x_blk_bytes < (1 << 20):
        want = max(1, min(B, (1 << 20) // max(x_blk_bytes, 1)))
        want = min(want, 16, max(1, B // 2))   # small unroll; keep >=2 grid steps
        bb = max(d for d in range(1, want + 1) if B % d == 0)

    est_bytes = (DB * bb * C_in * _round_up(tm, 8) * lane_n * x_item
                 + w_bytes
                 + DB * bb * co_pad * _round_up(tm, 128) * 4)
    # Explicit limit: raises v5e above its 16 MiB scoped default, stays well
    # under v7x's 64 MiB physical VMEM.
    vmem_limit = int(min(max(est_bytes + (8 << 20), 32 << 20), 48 << 20))

    def kernel(x_ref, w_ref, o_ref):
        # x_ref: (bb, C_in, tm, N)  native-dtype activation tile
        # w_ref: (C_in, C_out, N)   full weight, VMEM resident
        # o_ref: (bb, C_out, tm)    output tile, M on lanes
        #
        # TODO(synk): fuse the C_in reduction into one K=C_in*N MXU contraction
        # once Mosaic lowers multi-dim dot_general contractions in Pallas; the
        # per-channel 2D dots + VPU adds are neutral while HBM-bound.
        for b in range(bb):                    # static unroll, bb <= 16
            acc = None
            for j in range(C_in):              # static unroll, C_in is small
                wj = w_ref[j].astype(compute_dtype)      # [C_out, N]
                xj = x_ref[b, j].astype(compute_dtype)   # [tm, N]
                # Contract N (minor/lane axis of both operands) -> [C_out, tm].
                p = lax.dot_general(
                    wj, xj,
                    dimension_numbers=(((1,), (1,)), ((), ())),
                    preferred_element_type=jnp.float32)
                acc = p if acc is None else acc + p
            o_ref[b] = acc.astype(o_ref.dtype)

    grid = (B // bb, pl.cdiv(M, tm))

    return pl.pallas_call(
        kernel,
        out_shape=jax.ShapeDtypeStruct((B, C_out, M), jnp.float32),
        grid_spec=pltpu.PrefetchScalarGridSpec(
            num_scalar_prefetch=0,
            grid=grid,
            in_specs=[
                pl.BlockSpec((bb, C_in, tm, N), lambda b, mi: (b, 0, mi, 0)),
                pl.BlockSpec((C_in, C_out, N), lambda b, mi: (0, 0, 0)),
            ],
            out_specs=pl.BlockSpec((bb, C_out, tm), lambda b, mi: (b, 0, mi)),
        ),
        compiler_params=pltpu.CompilerParams(
            dimension_semantics=("parallel", "parallel"),
            vmem_limit_bytes=vmem_limit,
        ),
    )(x, w)


if __name__ == "__main__":
    # Small shapes consistent with the module: input [B, C_in, M, N].
    B, C_in, M, N = 2, 4, 16, 16
    C_out = 8

    key = jax.random.PRNGKey(0)
    kx, kw = jax.random.split(key)
    x = jax.random.normal(kx, (B, C_in, M, N), dtype=jnp.float32)
    # The module initializes X to ones; use random values for a stronger check
    # of the kernel itself (ones-init path checked below).
    X = jax.random.normal(kw, (C_out, C_in, N), dtype=jnp.float32)

    out = jax.block_until_ready(vectorizer_forward(x, X))
    ref = jnp.einsum("bjmn,ijn->bim", x, X)
    assert out.shape == (B, C_out, M)
    assert out.dtype == jnp.float32
    assert jnp.allclose(out, ref, atol=1e-4, rtol=1e-4)

    # Default-initialized (all-ones) parameter path, as in the module.
    X_ones = jnp.ones((C_out, C_in, N), dtype=jnp.float32)
    out_ones = jax.block_until_ready(vectorizer_forward(x, X_ones))
    ref_ones = jnp.einsum("bjmn,ijn->bim", x, X_ones)
    assert jnp.allclose(out_ones, ref_ones, atol=1e-4, rtol=1e-4)

    # bf16 activations stream at native width (no wrapper upcast); the cast
    # happens per-tile in-kernel and accumulation stays f32.
    x_bf16 = x.astype(jnp.bfloat16)
    out_bf16 = jax.block_until_ready(vectorizer_forward(x_bf16, X))
    ref_bf16 = jnp.einsum("bjmn,ijn->bim", x_bf16.astype(jnp.float32), X)
    assert jnp.allclose(out_bf16, ref_bf16, atol=1e-3, rtol=1e-3)

    print("KERNEL_OK")
</pallas_src>

<mosaic_0001>
module attributes {stable_mosaic.version = 11 : i64} {
  func.func @kernel(%arg0: i32, %arg1: i32, %arg2: memref<1x4x16x16xf32, #tpu.memory_space<vmem>>, %arg3: memref<4x8x16xf32, #tpu.memory_space<vmem>>, %arg4: memref<1x8x16xf32, #tpu.memory_space<vmem>>) attributes {dimension_semantics = [#tpu.dimension_semantics<parallel>, #tpu.dimension_semantics<parallel>], iteration_bounds = array<i64: 2, 1>, scalar_prefetch = 0 : i64, scratch_operands = 0 : i64, tpu.core_type = #tpu.core_type<tc>, window_params = [{transform_indices = @transform_0, window_bounds = array<i64: 1, 4, 16, 16>}, {pipeline_mode = #tpu.pipeline_mode<synchronous>, transform_indices = @transform_1, window_bounds = array<i64: 4, 8, 16>}, {transform_indices = @transform_2, window_bounds = array<i64: 1, 8, 16>}]} {
    %c0 = arith.constant 0 : index
    %c0_0 = arith.constant 0 : index
    %c0_1 = arith.constant 0 : index
    %0 = vector.load %arg3[%c0, %c0_0, %c0_1] : memref<4x8x16xf32, #tpu.memory_space<vmem>>, vector<1x8x16xf32>
    %1 = vector.shape_cast %0 : vector<1x8x16xf32> to vector<8x16xf32>
    %c0_2 = arith.constant 0 : index
    %c0_3 = arith.constant 0 : index
    %c0_4 = arith.constant 0 : index
    %c0_5 = arith.constant 0 : index
    %2 = vector.load %arg2[%c0_2, %c0_3, %c0_4, %c0_5] : memref<1x4x16x16xf32, #tpu.memory_space<vmem>>, vector<1x1x16x16xf32>
    %3 = vector.shape_cast %2 : vector<1x1x16x16xf32> to vector<16x16xf32>
    %cst = arith.constant dense<0.000000e+00> : vector<8x16xf32>
    %4 = tpu.matmul %1, %3, %cst {dimension_numbers = #tpu.dot_dimension_numbers<[1], [1], [0], [0], [0, 0, 1, 0], [], []>} : vector<8x16xf32>, vector<16x16xf32>, vector<8x16xf32> -> vector<8x16xf32>
    %c1 = arith.constant 1 : index
    %c0_6 = arith.constant 0 : index
    %c0_7 = arith.constant 0 : index
    %5 = vector.load %arg3[%c1, %c0_6, %c0_7] : memref<4x8x16xf32, #tpu.memory_space<vmem>>, vector<1x8x16xf32>
    %6 = vector.shape_cast %5 : vector<1x8x16xf32> to vector<8x16xf32>
    %c0_8 = arith.constant 0 : index
    %c1_9 = arith.constant 1 : index
    %c0_10 = arith.constant 0 : index
    %c0_11 = arith.constant 0 : index
    %7 = vector.load %arg2[%c0_8, %c1_9, %c0_10, %c0_11] : memref<1x4x16x16xf32, #tpu.memory_space<vmem>>, vector<1x1x16x16xf32>
    %8 = vector.shape_cast %7 : vector<1x1x16x16xf32> to vector<16x16xf32>
    %cst_12 = arith.constant dense<0.000000e+00> : vector<8x16xf32>
    %9 = tpu.matmul %6, %8, %cst_12 {dimension_numbers = #tpu.dot_dimension_numbers<[1], [1], [0], [0], [0, 0, 1, 0], [], []>} : vector<8x16xf32>, vector<16x16xf32>, vector<8x16xf32> -> vector<8x16xf32>
    %10 = arith.addf %4, %9 : vector<8x16xf32>
    %c2 = arith.constant 2 : index
    %c0_13 = arith.constant 0 : index
    %c0_14 = arith.constant 0 : index
    %11 = vector.load %arg3[%c2, %c0_13, %c0_14] : memref<4x8x16xf32, #tpu.memory_space<vmem>>, vector<1x8x16xf32>
    %12 = vector.shape_cast %11 : vector<1x8x16xf32> to vector<8x16xf32>
    %c0_15 = arith.constant 0 : index
    %c2_16 = arith.constant 2 : index
    %c0_17 = arith.constant 0 : index
    %c0_18 = arith.constant 0 : index
    %13 = vector.load %arg2[%c0_15, %c2_16, %c0_17, %c0_18] : memref<1x4x16x16xf32, #tpu.memory_space<vmem>>, vector<1x1x16x16xf32>
    %14 = vector.shape_cast %13 : vector<1x1x16x16xf32> to vector<16x16xf32>
    %cst_19 = arith.constant dense<0.000000e+00> : vector<8x16xf32>
    %15 = tpu.matmul %12, %14, %cst_19 {dimension_numbers = #tpu.dot_dimension_numbers<[1], [1], [0], [0], [0, 0, 1, 0], [], []>} : vector<8x16xf32>, vector<16x16xf32>, vector<8x16xf32> -> vector<8x16xf32>
    %16 = arith.addf %10, %15 : vector<8x16xf32>
    %c3 = arith.constant 3 : index
    %c0_20 = arith.constant 0 : index
    %c0_21 = arith.constant 0 : index
    %17 = vector.load %arg3[%c3, %c0_20, %c0_21] : memref<4x8x16xf32, #tpu.memory_space<vmem>>, vector<1x8x16xf32>
    %18 = vector.shape_cast %17 : vector<1x8x16xf32> to vector<8x16xf32>
    %c0_22 = arith.constant 0 : index
    %c3_23 = arith.constant 3 : index
    %c0_24 = arith.constant 0 : index
    %c0_25 = arith.constant 0 : index
    %19 = vector.load %arg2[%c0_22, %c3_23, %c0_24, %c0_25] : memref<1x4x16x16xf32, #tpu.memory_space<vmem>>, vector<1x1x16x16xf32>
    %20 = vector.shape_cast %19 : vector<1x1x16x16xf32> to vector<16x16xf32>
    %cst_26 = arith.constant dense<0.000000e+00> : vector<8x16xf32>
    %21 = tpu.matmul %18, %20, %cst_26 {dimension_numbers = #tpu.dot_dimension_numbers<[1], [1], [0], [0], [0, 0, 1, 0], [], []>} : vector<8x16xf32>, vector<16x16xf32>, vector<8x16xf32> -> vector<8x16xf32>
    %22 = arith.addf %16, %21 : vector<8x16xf32>
    %c0_27 = arith.constant 0 : index
    %c0_28 = arith.constant 0 : index
    %c0_29 = arith.constant 0 : index
    %23 = vector.load %arg4[%c0_27, %c0_28, %c0_29] : memref<1x8x16xf32, #tpu.memory_space<vmem>>, vector<1x8x16xf32>
    %24 = vector.shape_cast %23 : vector<1x8x16xf32> to vector<8x16xf32>
    %25 = vector.shape_cast %22 : vector<8x16xf32> to vector<1x8x16xf32>
    tpu.vector_store %arg4[%c0_27, %c0_28, %c0_29], %25 {strides = array<i32>} : memref<1x8x16xf32, #tpu.memory_space<vmem>>, vector<1x8x16xf32>,
    return
  }
  func.func @transform_0(%arg0: i32, %arg1: i32) -> (i32, i32, i32, i32) {
    %c0_i32 = arith.constant 0 : i32
    %c0_i32_0 = arith.constant 0 : i32
    %c0_i32_1 = arith.constant 0 : i32
    return %arg0, %c0_i32, %arg1, %c0_i32_0 : i32, i32, i32, i32
  }
  func.func @transform_1(%arg0: i32, %arg1: i32) -> (i32, i32, i32) {
    %c0_i32 = arith.constant 0 : i32
    %c0_i32_0 = arith.constant 0 : i32
    %c0_i32_1 = arith.constant 0 : i32
    %c0_i32_2 = arith.constant 0 : i32
    return %c0_i32, %c0_i32_0, %c0_i32_1 : i32, i32, i32
  }
  func.func @transform_2(%arg0: i32, %arg1: i32) -> (i32, i32, i32) {
    %c0_i32 = arith.constant 0 : i32
    %c0_i32_0 = arith.constant 0 : i32
    return %arg0, %c0_i32, %arg1 : i32, i32, i32
  }
}

</mosaic_0001>

<bundles_post_ra>
// kernel: tpu_custom_call.1
= control target key start
LH: loop header
LB: loop body
LE: loop exit
PB: predicated region body
PF: predicated region fallthrough
CT: control target
= control target key end

     0   :  { %7 = vsyncpa [#allocation3], 0  ;;  %s892_s0 = inlined_call_operand.hbm [shape: f32[2,4,16,16], index: 0, kind: input, shape index: {}]   ;;  %s893_s1 = inlined_call_operand.hbm [shape: f32[4,8,16], index: 1, kind: input, shape index: {}]   ;;  %s894_s2 = inlined_call_operand.hbm [shape: f32[2,8,16], index: 2, kind: output, shape index: {}]  }
   0x1   :  { %9 = vsyncpa [#allocation3 + $0x1], 0 }
   0x2   :  { %10 = vsyncpa [#allocation6], 0 }
   0x3   :  { %11 = vsyncpa [#allocation4], 0 }
   0x4   :  { %13 = vsyncpa [#allocation4 + $0x1], 0  ;;  %s723_s9 = smov 0   ;;  %s725_s10 = smov 0  }
   0x5   :  { %s727_s11 = smov 0   ;;  %s729_s12 = smov 0  }
   0x6   :  { %s731_s13 = smov 0   ;;  %s733_s14 = smov 0  }
   0x7 LB: > { %s447_s15 = sadd.s32 4294967295, %s703_s14   ;;  %s448_s16 = sadd.s32 4294967294, %s703_s14   ;;  %s703_s14 = sphi %s733_s14, %s19_s14   ;;  %s699_s13 = sphi %s731_s13, %s906_s13   ;;  %s695_s12 = sphi %s729_s12, %s905_s12   ;;  %s691_s11 = sphi %s727_s11, %s904_s11   ;;  %s687_s10 = sphi %s725_s10, %s903_s10   ;;  %s683_s9 = sphi %s723_s9, %s902_s9  }
   0x8   : > { %p53_p0 = scmp.ne.s32.totalorder %s687_s10, %s683_s9  ;;  %p757_p1 = scmp.eq.s32.totalorder %s447_s15, 0 }
   0x9   : > { %p761_p2 = scmp.eq.s32.totalorder %s447_s15, 1  ;;  %p106_p3 = scmp.eq.s32.totalorder %s448_s16, 1 }
   0xa   : > { %p767_p4 = por %p757_p1, %p53_p0  ;;  %p449_p5 = scmp.ge.s32.totalorder %s703_s14, 1 }
   0xb   : > { %p772_p6 = por %p106_p3, %p53_p0  ;;  %p113_p7 = scmp.lt.s32.totalorder %s703_s14, 3 }
   0xc   : > { %s124_s23 = sshll.u32 %s893_s1, 4  ;;  %s705_s25 = smov [#allocation5]   ;;  %s125_s23 = int_to_ptr.hbm [resolvable:$true] %s124_s23 }
   0xd   : > { %p780_p8 = pnand %p449_p5, %p113_p7  ;;  %s126_s26 = sshll.u32 %s705_s25, 4  ;;  %s127_s26 = int_to_ptr.vmem [resolvable:$true] %s126_s26 }
   0xe   : > { %p451_p11 = scmp.ge.s32.totalorder %s703_s14, 2  ;;  %s706_s27 = smov 128  }
   0xf   : > { %p490_p9 = pneg %p780_p8  ;;  %s707_s28 = smov 8  }
  0x10   : > { %s31_s29 = sadd.s32 1, %s699_s13  ;;  %s40_s30 = sadd.s32 1, %s691_s11 }
  0x11   : > { %p491_p10 = pnand %p490_p9, %p757_p1  ;;  %p33_p12 = scmp.ge.s32.totalorder %s31_s29, 2 }
  0x12   : > { %p47_p13 = scmp.ne.s32.totalorder %s691_s11, %s687_s10  ;;  %p48_p0 = scmp.eq.s32.totalorder %s703_s14, 0 }
  0x13   : > { %493 = dma.hbm_to_vmem [thread:$0]  (!%p491_p10), %s125_s23, 512, %s127_s26, [#allocation6], %s706_s27, %s706_s27, %s707_s28  }
  0x14   : > { %s908_s29 = smov (%p33_p12, %s31_s29), 0  ;;  %p799_p3 = por %p48_p0, %p47_p13 }
  0x15   : > { %p805_p5 = por %p761_p2, %p47_p13  ;;  %s35_s5 = ssub.s32 %s699_s13, %s908_s29 }
  0x16   : > { %p503_p7 = scmp.lt.s32.totalorder %s703_s14, 2  ;;  %p38_p9 = scmp.eq.s32.totalorder %s35_s5, 0 }
  0x17   : > { %s140_s6 = sand.u32 1, %s691_s11   ;;  %s481_s15 = sshll.u32 %s699_s13, 6 }
  0x18   : > { %s452_s7 = sshll.u32 %s140_s6, 6  ;;  %s151_s22 = scalar_lea.hbm %s892_s0, %s481_s15 }
  0x19   : > { %s814_s8 = scalar_select %p38_p9, %s691_s11, %s40_s30  }
  0x1a   : > { %s144_s23 = scalar_lea.vmem [#allocation2], %s452_s7  ;;  %s152_s18 = sshll.u32 %s151_s22, 4  ;;  %s153_s18 = int_to_ptr.hbm [resolvable:$true] %s152_s18 }
  0x1b   : > { %s154_s25 = sshll.u32 %s144_s23, 4  ;;  %p495_p2 = pnand %p503_p7, %p799_p3  ;;  %s155_s25 = int_to_ptr.vmem [resolvable:$true] %s154_s25 }
  0x1c   : > { %s141_s26 = scalar_lea.sflag [#allocation3], %s140_s6  ;;  %166 = sbr.rel (%p780_p8) target bundleno = 183 (0xb7), region = 28 }
  0x1d   : > { %497 = dma.hbm_to_vmem [thread:$0]  (!%p495_p2), %s153_s18, 1024, %s155_s25, %s141_s26, %s706_s27, %s706_s27, %s707_s28  }
  0x1e   : > { %s828_s30 = sand.u32 (!%p780_p8), 1, %s687_s10  }
  0x1f   : > { %s456_s5 = sshll.u32 (!%p780_p8), %s828_s30, 6  ;;  %s169_s7 = scalar_lea.sflag (!%p780_p8), [#allocation3], %s828_s30 }
  0x20   : > { %s172_s15 = scalar_lea.vmem (!%p780_p8), [#allocation2], %s456_s5 }
  0x21   : > { %670 = dma.done.wait (%p767_p4), %s169_s7, 1024  }
  0x22   : > { %672 = vsyncadd (%p767_p4), %s169_s7, 4294966272 }
  0x23   : > { %674 = dma.done.wait (%p757_p1), [#allocation6], 512  }
  0x24   : > { %676 = vsyncadd (%p757_p1), [#allocation6], 4294966784  ;;  %vm208_vm0 = vcmask 130048   ;;  %v468_v0 = vld [vmem:[%s172_s15 + $0x28] sm:$0xff]  ;;  %v473_v1 = vld [vmem:[%s172_s15 + $0x38] sm:$0xff]  ;;  %s458_s17 = sshll.u32 %s828_s30, 3 }
  0x25   : > { %v460_v2 = vld [vmem:[%s172_s15 + $0x18] sm:$0xff]  ;;  %469 = vmatpush.xpose.msk.msra.mxu2 %vm208_vm0, %v468_v0  ;;  %474 = vmatpush.xpose.msk.msra.mxu3 %vm208_vm0, %v473_v1  ;;  %v202_v3 = vld [vmem:[%s172_s15 + $0x8] sm:$0xff]  ;;  %v467_v4 = vld [vmem:[%s172_s15 + $0x20] sm:$0xff]  ;;  %s478_s19 = sshll.u32 %s695_s12, 3  ;;  %s198_s3 = scalar_lea.vmem [#allocation7], %s458_s17 }
  0x26   : > { %461 = vmatpush.xpose.msk.msra.mxu0 %vm208_vm0, %v460_v2  ;;  %464 = vmatpush.xpose.msk.msra.mxu1 %vm208_vm0, %v202_v3  ;;  %v472_v5 = vld [vmem:[%s172_s15 + $0x30] sm:$0xff]  ;;  %v201_v7 = vld [vmem:[%s172_s15] sm:$0xff]  ;;  %v303_v9 = vld [vmem:[#allocation5 + $0x18] sm:$0xff]  ;;  %s350_s28 = scalar_lea.hbm %s894_s2, %s478_s19  ;;  %s352_s6 = sshll.u32 %s198_s3, 4  ;;  %s353_s6 = int_to_ptr.vmem [resolvable:$true] %s352_s6 }
  0x27   : > { %v459_v6 = vld [vmem:[%s172_s15 + $0x10] sm:$0xff]  ;;  %v204_v10 = vld [vmem:[#allocation5 + $0x8] sm:$0xff]  ;;  %v200_v11 = vld [vmem:[#allocation5] sm:$0xff]  ;;  %s354_s16 = sshll.u32 %s350_s28, 4  ;;  %s339_s12 = scalar_lea.sflag [#allocation4], %s828_s30  ;;  %s355_s16 = int_to_ptr.hbm [resolvable:$true] %s354_s16 }
  0x28   : > { %v268_v8 = vld [vmem:[#allocation5 + $0x10] sm:$0xff]  ;;  %s631_s21 = sshra.s32 %s355_s16, 4  ;;  %s637_s18 = scalar_lea.hbm %s894_s2, 16  ;;  %s632_s21 = int_to_ptr.hbm [resolvable:$true] %s631_s21 }
  0x29   : > { %470 = vmatpush.xpose.msk.msra.mxu2 %vm208_vm0, %v467_v4  ;;  %475 = vmatpush.xpose.msk.msra.mxu3 %vm208_vm0, %v472_v5  ;;  %s633_s22 = scalar_lea.hbm %s632_s21, 8  ;;  %p638_p10 = scmp.lt.s32.totalorder %s632_s21, %s894_s2 }
  0x2a   : > { %462 = vmatpush.xpose.msk.msra.mxu0 %vm208_vm0, %v459_v6  ;;  %465 = vmatpush.xpose.msk.msra.mxu1 %vm208_vm0, %v201_v7  ;;  %p634_p1 = scmp.ne.s32.totalorder %s632_s21, %s633_s22  ;;  %p639_p12 = scmp.lt.s32.totalorder %s637_s18, %s633_s22 }
  0x2c   : > { %471 = vmatmul.msk.f32.vlgmr.msra.gmra.mxu2 %vm208_vm0, %v268_v8  ;;  %476 = vmatmul.msk.f32.vlgmr.msra.gmra.mxu3 %vm208_vm0, %v303_v9  ;;  %p635_p4 = pnand %p634_p1, %p805_p5  ;;  %p640_p13 = por %p639_p12, %p638_p10 }
  0x2d   : > { %463 = vmatmul.msk.f32.vlgmr.msra.gmra.mxu0 %vm208_vm0, %v204_v10  ;;  %466 = vmatmul.msk.f32.vlgmr.msra.gmra.mxu1 %vm208_vm0, %v200_v11 }
  0x2e   : > { %p636_p8 = pneg %p635_p4 }
  0x30   : > { %p641_p0 = pnand %p640_p13, %p636_p8 }
  0xaa   : > { %v235_v12 = vpop.f32.mrf.mxu0  ;;  %v264_v13 = vpop.f32.mrf.mxu1 }
  0xab   : > { %v265_v14 = vadd.f32 %v264_v13, %v235_v12 }
  0xaf   : > { %v298_v15 = vpop.f32.mrf.mxu2  ;;  %v333_v16 = vpop.f32.mrf.mxu3 }
  0xb0   : > { %v301_v17 = vadd.f32 %v298_v15, %v265_v14 }
  0xb2   : > { %v336_v18 = vadd.f32 %v333_v16, %v301_v17 }
  0xb4   : > { %337 = vst.msk [vmem:[%s198_s3] sm:$0xff] %vm208_vm0, %v336_v18 }
  0xb5   : > { %644 = shalt.err (!%p641_p0)
}
  0xb6   : > { %488 = dma.vmem_to_hbm [thread:$0]  (%p805_p5), %s353_s6, 128, %s355_s16, %s339_s12  }
  0xb7 PF: > { %s366_s30 = sand.u32 1, %s683_s9   ;;  %p499_p3 = pnand %p451_p11, %p772_p6 }
  0xb8   : > { %s367_s7 = scalar_lea.sflag [#allocation4], %s366_s30 }
  0xb9   : > { %p500_p7 = pneg %p499_p3 }
  0xbb   : > { %678 = dma.done.wait (%p500_p7), %s367_s7, 128  }
  0xbc   : > { %680 = vsyncadd (%p500_p7), %s367_s7, 4294967168  ;;  %s19_s14 = sadd.s32 1, %s703_s14   ;;  %s902_s9 = smov %s687_s10 }
  0xbd   : > { %p16_p9 = scmp.ge.s32.totalorder %s19_s14, 4   ;;  %s903_s10 = smov %s691_s11 }
  0xbe   : > { %s904_s11 = smov %s814_s8  ;;  %s905_s12 = smov %s699_s13 }
  0xbf   : > { %s906_s13 = smov %s908_s29  ;;  %18 = sbr.rel (!%p16_p9) target bundleno = 7 (0x7), region = 83 }
  0xc4   :  { %373 = vsyncpa [#allocation3], 1 }
  0xc5   :  { %375 = vsyncpa [#allocation3 + $0x1], 1 }
  0xc6   :  { %376 = vsyncpa [#allocation6], 1 }
  0xc7   :  { %377 = vsyncpa [#allocation4], 1 }
  0xc8   :  { %379 = vsyncpa [#allocation4 + $0x1], 1 }

</bundles_post_ra>
